<compile_context>
chip_gen: v6e
topology: v6e:2x2x1
jax: 0.10.0
libtpu: 0.0.40
codegen_flags: <defaults>
</compile_context>

<pallas_src>
import jax
import jax.numpy as jnp
from jax import lax
from jax.experimental import pallas as pl
from jax.experimental.pallas import tpu as pltpu


_MAX_FUSED_ENTITIES = 1024            # one-hot gather stays cheaper than streaming
_MAX_FUSED_TABLE_BYTES = 4 * 1024 * 1024


# ----------------------------------------------------------------------------
# Hardware query
# ----------------------------------------------------------------------------
def _vmem_capacity_bytes():
    try:
        cap = getattr(pltpu.get_tpu_info(), "vmem_capacity_bytes", None)
        if cap:
            return int(cap)
    except Exception:
        pass
    return 64 * 1024 * 1024           # conservative fallback (v7x-sized)


# ----------------------------------------------------------------------------
# Kernels
# ----------------------------------------------------------------------------
def _make_stream_kernel(k, d, use_bias):
    """Streaming multiply-reduce over pre-gathered rows, k samples per 128-lane row."""
    w = k * d

    def kernel(*refs):
        if use_bias:
            e1_ref, e2_ref, bias_ref, o_ref = refs
        else:
            e1_ref, e2_ref, o_ref = refs
        # (tile_rows, w) tiles in the table dtype -> f32 accumulation.
        prod = e1_ref[...].astype(jnp.float32) * e2_ref[...].astype(jnp.float32)
        if k == 1:
            red = jnp.sum(prod, axis=-1)          # (tile_rows,)
            out = red.reshape(1, -1)              # lane-dense (1, tile_b) store
        else:
            # Segment-sum over the k packed samples per row as a tiny MXU matmul
            # against a block-diagonal 0/1 selector (avoids cross-lane reshapes).
            row_id = lax.broadcasted_iota(jnp.int32, (w, k), 0)
            col_id = lax.broadcasted_iota(jnp.int32, (w, k), 1)
            seg = (row_id // d == col_id).astype(jnp.float32)
            out = jnp.dot(prod, seg, preferred_element_type=jnp.float32)  # (tile_rows, k)
        if use_bias:
            out = out + bias_ref[0]
        o_ref[...] = out

    return kernel


def _make_fused_kernel(num_entity, use_bias):
    """Fused gather + multiply-reduce; tables are VMEM-resident, gather = one-hot MXU matmul."""

    def kernel(*refs):
        if use_bias:
            i1_ref, i2_ref, tin_ref, tout_ref, bias_ref, o_ref = refs
        else:
            i1_ref, i2_ref, tin_ref, tout_ref, o_ref = refs
        tb = i1_ref.shape[0]
        ent = lax.broadcasted_iota(jnp.int32, (tb, num_entity), 1)
        oh1 = (i1_ref[...] == ent).astype(tin_ref.dtype)   # (tb, N) one-hot
        oh2 = (i2_ref[...] == ent).astype(tout_ref.dtype)
        e1 = jnp.dot(oh1, tin_ref[...], preferred_element_type=jnp.float32)   # (tb, D)
        e2 = jnp.dot(oh2, tout_ref[...], preferred_element_type=jnp.float32)
        red = jnp.sum(e1 * e2, axis=-1)                    # (tb,) f32
        out = red.reshape(1, -1)                           # lane-dense (1, tile_b)
        if use_bias:
            out = out + bias_ref[0]
        o_ref[...] = out

    return kernel


# ----------------------------------------------------------------------------
# Path implementations
# ----------------------------------------------------------------------------
def _fused_call(emb_in, emb_out, flat, bias_op, tile_b, vmem_limit):
    B = flat.shape[0]
    N, D = emb_in.shape

    if tile_b is None:
        # Bound in-kernel intermediates: two (tile_b, N) f32 one-hots (~4 MiB)
        # and three (tile_b, D) f32 gathered/product tiles (~6 MiB).
        t = min((4 * 1024 * 1024) // max(2 * N * 4, 1),
                (6 * 1024 * 1024) // max(3 * D * 4, 1))
        t = max(128, min(8192, int(t)))
        t = (t // 128) * 128
    else:
        t = max(128, (int(tile_b) // 128) * 128)
    b_aligned = ((B + 127) // 128) * 128
    tile_b = int(min(t, b_aligned))

    Bp = pl.cdiv(B, tile_b) * tile_b
    if Bp != B:
        flat = jnp.pad(flat, ((0, Bp - B), (0, 0)))        # pad rows gather entity 0
    i1 = flat[:, 0:1]                                      # (Bp, 1) int32
    i2 = flat[:, 1:2]
    num_tiles = Bp // tile_b
    use_bias = bias_op is not None

    in_specs = [
        pl.BlockSpec((tile_b, 1), lambda i: (i, 0)),       # streamed indices
        pl.BlockSpec((tile_b, 1), lambda i: (i, 0)),
        pl.BlockSpec((N, D), lambda i: (0, 0)),            # VMEM-resident tables
        pl.BlockSpec((N, D), lambda i: (0, 0)),
    ]
    operands = [i1, i2, emb_in, emb_out]
    if use_bias:
        in_specs.append(pl.BlockSpec(memory_space=pltpu.MemorySpace.SMEM))
        operands.append(bias_op)

    out = pl.pallas_call(
        _make_fused_kernel(N, use_bias),
        out_shape=jax.ShapeDtypeStruct((num_tiles, tile_b), jnp.float32),
        grid=(num_tiles,),
        in_specs=in_specs,
        out_specs=pl.BlockSpec((1, tile_b), lambda i: (i, 0)),
        compiler_params=pltpu.CompilerParams(
            dimension_semantics=("parallel",),
            vmem_limit_bytes=vmem_limit,
        ),
    )(*operands)
    return out.reshape(-1)


def _stream_call(emb_in, emb_out, flat, bias_op, tile_b, cap, vmem_limit):
    B = flat.shape[0]
    D = emb_in.shape[1]
    itemsize = jnp.dtype(emb_in.dtype).itemsize

    # Lane packing: k samples share one 128-lane row when D < 128.
    k = min(128 // D, 16) if (D < 128 and 128 % D == 0) else 1
    # TODO(synk): D < 128 with 128 % D != 0 stays lane-sparse (needs pad-to-segment packing).

    if tile_b is None:
        budget = cap // 3                                  # generation-aware input budget
        # 2 inputs x 2 pipeline buffers x D x itemsize, plus ~3 live f32
        # intermediates (two upcasts + product) per sample inside the kernel.
        per_sample = 4 * D * itemsize + 12 * D + 8
        t = budget // max(per_sample, 1)
        t = max(128, min(16384, int(t)))
        t = (t // 128) * 128
    else:
        t = max(128, (int(tile_b) // 128) * 128)
    b_aligned = ((B + 127) // 128) * 128
    tile_b = int(min(t, b_aligned))

    Bp = pl.cdiv(B, tile_b) * tile_b
    if Bp != B:
        flat = jnp.pad(flat, ((0, Bp - B), (0, 0)))

    # Row gather stays in the wrapper for large tables (native dtype, no upcast copy).
    e1 = jnp.take(emb_in, flat[:, 0], axis=0)              # (Bp, D)
    e2 = jnp.take(emb_out, flat[:, 1], axis=0)

    rows = Bp // k
    w = k * D
    if k > 1:                                              # lane-pack: contiguous reshape
        e1 = e1.reshape(rows, w)
        e2 = e2.reshape(rows, w)

    num_tiles = Bp // tile_b
    tile_rows = tile_b // k
    use_bias = bias_op is not None

    in_specs = [pl.BlockSpec((tile_rows, w), lambda i: (i, 0)),
                pl.BlockSpec((tile_rows, w), lambda i: (i, 0))]
    operands = [e1, e2]
    if use_bias:
        in_specs.append(pl.BlockSpec(memory_space=pltpu.MemorySpace.SMEM))
        operands.append(bias_op)

    if k == 1:
        out_shape = jax.ShapeDtypeStruct((num_tiles, tile_b), jnp.float32)
        out_spec = pl.BlockSpec((1, tile_b), lambda i: (i, 0))
    else:
        out_shape = jax.ShapeDtypeStruct((rows, k), jnp.float32)
        out_spec = pl.BlockSpec((tile_rows, k), lambda i: (i, 0))

    out = pl.pallas_call(
        _make_stream_kernel(k, D, use_bias),
        out_shape=out_shape,
        grid=(num_tiles,),
        in_specs=in_specs,
        out_specs=out_spec,
        compiler_params=pltpu.CompilerParams(
            dimension_semantics=("parallel",),
            vmem_limit_bytes=vmem_limit,
        ),
    )(*operands)
    return out.reshape(-1)


# ----------------------------------------------------------------------------
# Wrapper: VectorSim.forward(idxs)
# ----------------------------------------------------------------------------
def vector_sim_logits(emb_in, emb_out, bias, idxs, *, tile_b=None, fuse_gather=None):
    """logits[...] = sum(emb_in[idxs[...,0]] * emb_out[idxs[...,1]], -1) + bias."""
    lead_shape = idxs.shape[:-1]
    flat = idxs.reshape(-1, 2).astype(jnp.int32)
    B = flat.shape[0]
    N, D = emb_in.shape
    itemsize = jnp.dtype(emb_in.dtype).itemsize

    use_bias = not (bias is None or (isinstance(bias, (int, float)) and bias == 0.0))
    bias_op = jnp.asarray(bias, dtype=jnp.float32).reshape(1) if use_bias else None

    cap = _vmem_capacity_bytes()
    vmem_limit = int(max(32 * 1024 * 1024, min(cap * 3 // 4, 96 * 1024 * 1024)))

    if fuse_gather is None:
        fuse_gather = (N <= _MAX_FUSED_ENTITIES
                       and 2 * N * D * itemsize <= _MAX_FUSED_TABLE_BYTES)

    if fuse_gather:
        flat_out = _fused_call(emb_in, emb_out, flat, bias_op, tile_b, vmem_limit)
    else:
        flat_out = _stream_call(emb_in, emb_out, flat, bias_op, tile_b, cap, vmem_limit)
    return flat_out[:B].reshape(lead_shape)


# ----------------------------------------------------------------------------
# Demo / correctness check
# ----------------------------------------------------------------------------
if __name__ == "__main__":
    key = jax.random.PRNGKey(0)
    k_in, k_out, k_idx = jax.random.split(key, 3)

    num_entity = 32
    dim = 32                       # hidden dim
    batch_shape = (2, 4)           # idxs: (2, 4, 2)

    # Deterministic synthetic parameters (torch Embedding default: N(0, 1)).
    embeddings_in = jax.random.normal(k_in, (num_entity, dim), dtype=jnp.float32)
    embeddings_out = jax.random.normal(k_out, (num_entity, dim), dtype=jnp.float32)
    idxs = jax.random.randint(k_idx, batch_shape + (2,), 0, num_entity, dtype=jnp.int32)

    # Reference (pure JAX).
    ref = jnp.sum(embeddings_in[idxs[..., 0]] * embeddings_out[idxs[..., 1]], axis=-1)

    # Fused-gather path (tables resident in VMEM), default config: use_bias=False.
    out_fused = vector_sim_logits(embeddings_in, embeddings_out, 0.0, idxs)
    jax.block_until_ready(out_fused)
    assert out_fused.shape == ref.shape, (out_fused.shape, ref.shape)
    assert jnp.allclose(out_fused, ref, atol=1e-5, rtol=1e-5), "fused path mismatch (no bias)"

    # Fused-gather path with a learned scalar bias.
    out_fused_b = vector_sim_logits(embeddings_in, embeddings_out, jnp.float32(0.25), idxs)
    jax.block_until_ready(out_fused_b)
    assert jnp.allclose(out_fused_b, ref + 0.25, atol=1e-5, rtol=1e-5), "fused path mismatch (bias)"

    # Streaming path (wrapper gather + lane-packed kernel, D=32 -> k=4), both bias modes.
    out_stream = vector_sim_logits(embeddings_in, embeddings_out, 0.0, idxs, fuse_gather=False)
    jax.block_until_ready(out_stream)
    assert jnp.allclose(out_stream, ref, atol=1e-5, rtol=1e-5), "streaming path mismatch (no bias)"

    out_stream_b = vector_sim_logits(embeddings_in, embeddings_out, jnp.float32(0.25), idxs,
                                     fuse_gather=False)
    jax.block_until_ready(out_stream_b)
    assert jnp.allclose(out_stream_b, ref + 0.25, atol=1e-5, rtol=1e-5), "streaming path mismatch (bias)"

    print("KERNEL_OK")
</pallas_src>

<mosaic_0001>
module attributes {stable_mosaic.version = 11 : i64} {
  func.func @kernel(%arg0: i32, %arg1: memref<128x1xi32, #tpu.memory_space<vmem>>, %arg2: memref<128x1xi32, #tpu.memory_space<vmem>>, %arg3: memref<32x32xf32, #tpu.memory_space<vmem>>, %arg4: memref<32x32xf32, #tpu.memory_space<vmem>>, %arg5: memref<1x128xf32, #tpu.memory_space<vmem>>) attributes {dimension_semantics = [#tpu.dimension_semantics<parallel>], iteration_bounds = array<i64: 1>, scalar_prefetch = 0 : i64, scratch_operands = 0 : i64, tpu.core_type = #tpu.core_type<tc>, window_params = [{transform_indices = @transform_0, window_bounds = array<i64: 128, 1>}, {transform_indices = @transform_1, window_bounds = array<i64: 128, 1>}, {pipeline_mode = #tpu.pipeline_mode<synchronous>, transform_indices = @transform_2, window_bounds = array<i64: 32, 32>}, {pipeline_mode = #tpu.pipeline_mode<synchronous>, transform_indices = @transform_3, window_bounds = array<i64: 32, 32>}, {transform_indices = @transform_4, window_bounds = array<i64: 1, 128>}]} {
    %0 = tpu.iota {dimensions = array<i32: 1>} : vector<128x32xi32>
    %c0 = arith.constant 0 : index
    %c0_0 = arith.constant 0 : index
    %1 = vector.load %arg1[%c0, %c0_0] : memref<128x1xi32, #tpu.memory_space<vmem>>, vector<128x1xi32>
    %2 = vector.broadcast %1 : vector<128x1xi32> to vector<128x32xi32>
    %3 = arith.cmpi eq, %2, %0 : vector<128x32xi32>
    %4 = arith.extui %3 : vector<128x32xi1> to vector<128x32xi32>
    %5 = arith.sitofp %4 : vector<128x32xi32> to vector<128x32xf32>
    %c0_1 = arith.constant 0 : index
    %c0_2 = arith.constant 0 : index
    %6 = vector.load %arg2[%c0_1, %c0_2] : memref<128x1xi32, #tpu.memory_space<vmem>>, vector<128x1xi32>
    %7 = vector.broadcast %6 : vector<128x1xi32> to vector<128x32xi32>
    %8 = arith.cmpi eq, %7, %0 : vector<128x32xi32>
    %9 = arith.extui %8 : vector<128x32xi1> to vector<128x32xi32>
    %10 = arith.sitofp %9 : vector<128x32xi32> to vector<128x32xf32>
    %c0_3 = arith.constant 0 : index
    %c0_4 = arith.constant 0 : index
    %11 = vector.load %arg3[%c0_3, %c0_4] : memref<32x32xf32, #tpu.memory_space<vmem>>, vector<32x32xf32>
    %cst = arith.constant dense<0.000000e+00> : vector<128x32xf32>
    %12 = tpu.matmul %5, %11, %cst {dimension_numbers = #tpu.dot_dimension_numbers<[1], [0], [0], [1], [0, 0, 1, 1], [], []>} : vector<128x32xf32>, vector<32x32xf32>, vector<128x32xf32> -> vector<128x32xf32>
    %c0_5 = arith.constant 0 : index
    %c0_6 = arith.constant 0 : index
    %13 = vector.load %arg4[%c0_5, %c0_6] : memref<32x32xf32, #tpu.memory_space<vmem>>, vector<32x32xf32>
    %cst_7 = arith.constant dense<0.000000e+00> : vector<128x32xf32>
    %14 = tpu.matmul %10, %13, %cst_7 {dimension_numbers = #tpu.dot_dimension_numbers<[1], [0], [0], [1], [0, 0, 1, 1], [], []>} : vector<128x32xf32>, vector<32x32xf32>, vector<128x32xf32> -> vector<128x32xf32>
    %15 = arith.mulf %12, %14 : vector<128x32xf32>
    %cst_8 = arith.constant dense<0.000000e+00> : vector<128xf32>
    %16 = vector.multi_reduction <add>, %15, %cst_8 [1] : vector<128x32xf32> to vector<128xf32>
    %17 = vector.shape_cast %16 : vector<128xf32> to vector<1x128xf32>
    %c0_9 = arith.constant 0 : index
    %c0_10 = arith.constant 0 : index
    %18 = vector.load %arg5[%c0_9, %c0_10] : memref<1x128xf32, #tpu.memory_space<vmem>>, vector<1x128xf32>
    tpu.vector_store %arg5[%c0_9, %c0_10], %17 {strides = array<i32>} : memref<1x128xf32, #tpu.memory_space<vmem>>, vector<1x128xf32>,
    return
  }
  func.func @transform_0(%arg0: i32) -> (i32, i32) {
    %c0_i32 = arith.constant 0 : i32
    %c0_i32_0 = arith.constant 0 : i32
    return %arg0, %c0_i32 : i32, i32
  }
  func.func @transform_1(%arg0: i32) -> (i32, i32) {
    %c0_i32 = arith.constant 0 : i32
    %c0_i32_0 = arith.constant 0 : i32
    return %arg0, %c0_i32 : i32, i32
  }
  func.func @transform_2(%arg0: i32) -> (i32, i32) {
    %c0_i32 = arith.constant 0 : i32
    %c0_i32_0 = arith.constant 0 : i32
    %c0_i32_1 = arith.constant 0 : i32
    return %c0_i32, %c0_i32_0 : i32, i32
  }
  func.func @transform_3(%arg0: i32) -> (i32, i32) {
    %c0_i32 = arith.constant 0 : i32
    %c0_i32_0 = arith.constant 0 : i32
    %c0_i32_1 = arith.constant 0 : i32
    return %c0_i32, %c0_i32_0 : i32, i32
  }
  func.func @transform_4(%arg0: i32) -> (i32, i32) {
    %c0_i32 = arith.constant 0 : i32
    %c0_i32_0 = arith.constant 0 : i32
    return %arg0, %c0_i32 : i32, i32
  }
}

</mosaic_0001>

<bundles_post_ra>
// kernel: tpu_custom_call.1
= control target key start
LH: loop header
LB: loop body
LE: loop exit
PB: predicated region body
PF: predicated region fallthrough
CT: control target
= control target key end

     0   :  { %v1039_v2 = vmov 0   ;;  %s1340_s0 = inlined_call_operand.vmem [shape: s32[128,1], index: 0, kind: input, shape index: {}]   ;;  %s1341_s1 = inlined_call_operand.vmem [shape: s32[128,1], index: 1, kind: input, shape index: {}]   ;;  %s1342_s2 = inlined_call_operand.vmem [shape: f32[32,32], index: 2, kind: input, shape index: {}]   ;;  %s1343_s3 = inlined_call_operand.vmem [shape: f32[32,32], index: 3, kind: input, shape index: {}]   ;;  %s1344_s4 = inlined_call_operand.hbm [shape: f32[1,128], index: 4, kind: output, shape index: {}]  }
   0x1   :  { %v21_v0 = vld [vmem:[%s1340_s0 + $0x8] sm:$0xff]  ;;  %v20_v1 = vld [vmem:[%s1340_s0] sm:$0xff]  ;;  %1016 = vset.pattern.permute.xlu1 %v1039_v2  ;;  %1015 = vset.pattern.permute.xlu0 %v1039_v2  ;;  %v134_v5 = vld [vmem:[%s1341_s1 + $0x10] sm:$0xff] }
   0x2   :  { %40 = vperm.xlu1 %1016, %v21_v0   ;;  %37 = vperm.xlu0 %1015, %v20_v1   ;;  %v133_v3 = vld [vmem:[%s1341_s1 + $0x8] sm:$0xff]  ;;  %v132_v4 = vld [vmem:[%s1341_s1] sm:$0xff]  ;;  %v22_v6 = vld [vmem:[%s1340_s0 + $0x10] sm:$0xff] }
   0x3   :  { %v135_v7 = vld [vmem:[%s1341_s1 + $0x18] sm:$0xff]  ;;  %v246_v10 = vld [vmem:[%s1342_s2 + $0x10] sm:$0xff]  ;;  %v245_v13 = vld [vmem:[%s1342_s2 + $0x8] sm:$0xff] }
   0x4   :  { %v247_v8 = vld [vmem:[%s1342_s2 + $0x18] sm:$0xff]  ;;  %v444_v12 = vld [vmem:[%s1343_s3 + $0x10] sm:$0xff] }
   0x5   :  { %v23_v9 = vld [vmem:[%s1340_s0 + $0x18] sm:$0xff]  ;;  %948 = vmatprep.subr.mxu0 %v247_v8 }
   0x6   :  { %152 = vperm.xlu1 %1016, %v133_v3   ;;  %149 = vperm.xlu0 %1015, %v132_v4   ;;  %v445_v11 = vld [vmem:[%s1343_s3 + $0x18] sm:$0xff] }
   0x7   :  { %949 = vmatpush3.msra.mxu0 %v247_v8  ;;  %980 = vmatprep.subr.mxu1 %v445_v11 }
   0x8   :  { %950 = vmatprep.subr.mxu0 %v246_v10  ;;  %981 = vmatpush3.msra.mxu1 %v445_v11 }
   0xa   :  { %155 = vperm.xlu1 %1016, %v134_v5   ;;  %43 = vperm.xlu0 %1015, %v22_v6  }
   0xb   :  { %9 = vsyncpa [#allocation3], 0  ;;  %v443_v14 = vld [vmem:[%s1343_s3 + $0x8] sm:$0xff]  ;;  %v136_v15 = vld [vmem:[%s1341_s1 + $0x20] sm:$0xff]  ;;  %951 = vmatpush3.msra.mxu0 %v246_v10  ;;  %982 = vmatprep.subr.mxu1 %v444_v12  ;;  %v18_v41 = vlaneseq  ;;  %vm248_vm0 = vcmask 261120   ;;  %v1040_v45 = vmov 0.0  }
   0xc   :  { %v24_v16 = vld [vmem:[%s1340_s0 + $0x20] sm:$0xff]  ;;  %952 = vmatprep.subr.mxu0 %v245_v13  ;;  %983 = vmatpush3.msra.mxu1 %v444_v12  ;;  %v137_v19 = vld [vmem:[%s1341_s1 + $0x28] sm:$0xff]  ;;  %v138_v21 = vld [vmem:[%s1341_s1 + $0x30] sm:$0xff] }
   0xd   :  { %v244_v17 = vld [vmem:[%s1342_s2] sm:$0xff]  ;;  %953 = vmatpush3.msra.mxu0 %v245_v13  ;;  %984 = vmatprep.subr.mxu1 %v443_v14  ;;  %v25_v20 = vld [vmem:[%s1340_s0 + $0x28] sm:$0xff]  ;;  %v26_v22 = vld [vmem:[%s1340_s0 + $0x30] sm:$0xff]  ;;  %v1188_v42 = vand.u32 127, %v18_v41 }
   0xe   :  { %158 = vperm.xlu1 %1016, %v135_v7   ;;  %46 = vperm.xlu0 %1015, %v23_v9   ;;  %v442_v18 = vld [vmem:[%s1343_s3] sm:$0xff]  ;;  %v139_v23 = vld [vmem:[%s1341_s1 + $0x38] sm:$0xff]  ;;  %v141_v27 = vld [vmem:[%s1341_s1 + $0x48] sm:$0xff] }
   0xf   :  { %954 = vmatprep.subr.mxu0 %v244_v17  ;;  %985 = vmatpush3.msra.mxu1 %v443_v14  ;;  %v27_v24 = vld [vmem:[%s1340_s0 + $0x38] sm:$0xff]  ;;  %v140_v25 = vld [vmem:[%s1341_s1 + $0x40] sm:$0xff]  ;;  %v29_v28 = vld [vmem:[%s1340_s0 + $0x48] sm:$0xff] }
  0x10   :  { %955 = vmatpush3.msra.mxu0 %v244_v17  ;;  %986 = vmatprep.subr.mxu1 %v442_v18  ;;  %v28_v26 = vld [vmem:[%s1340_s0 + $0x40] sm:$0xff]  ;;  %v142_v29 = vld [vmem:[%s1341_s1 + $0x50] sm:$0xff]  ;;  %v143_v31 = vld [vmem:[%s1341_s1 + $0x58] sm:$0xff] }
  0x11   :  { %987 = vmatpush3.msra.mxu1 %v442_v18  ;;  %v30_v30 = vld [vmem:[%s1340_s0 + $0x50] sm:$0xff]  ;;  %v31_v32 = vld [vmem:[%s1340_s0 + $0x58] sm:$0xff]  ;;  %v144_v33 = vld [vmem:[%s1341_s1 + $0x60] sm:$0xff] }
  0x12   :  { %161 = vperm.xlu1 %1016, %v136_v15   ;;  %49 = vperm.xlu0 %1015, %v24_v16   ;;  %v32_v34 = vld [vmem:[%s1340_s0 + $0x60] sm:$0xff]  ;;  %v145_v35 = vld [vmem:[%s1341_s1 + $0x68] sm:$0xff]  ;;  %v146_v37 = vld [vmem:[%s1341_s1 + $0x70] sm:$0xff] }
  0x13   :  { %v33_v36 = vld [vmem:[%s1340_s0 + $0x68] sm:$0xff]  ;;  %v34_v38 = vld [vmem:[%s1340_s0 + $0x70] sm:$0xff]  ;;  %v147_v39 = vld [vmem:[%s1341_s1 + $0x78] sm:$0xff] }
  0x14   :  { %v35_v40 = vld [vmem:[%s1340_s0 + $0x78] sm:$0xff]  ;;  %s1041_s0 = smov [#allocation2]  }
  0x15   :  { %s836_s1 = sshll.u32 %s1041_s0, 4  ;;  %s837_s1 = int_to_ptr.vmem [resolvable:$true] %s836_s1 }
  0x16   :  { %164 = vperm.xlu1 %1016, %v137_v19   ;;  %52 = vperm.xlu0 %1015, %v25_v20   ;;  %s1017_s13 = scalar_lea.vmem %s837_s1, 16  ;;  %s1021_s14 = scalar_lea.vmem %s837_s1, 32 }
  0x17   :  { %p1018_p0 = scmp.ne.s32.totalorder %s837_s1, %s1017_s13  ;;  %p1022_p1 = scmp.lt.s32.totalorder %s837_s1, %s837_s1 }
  0x18   :  { %p1023_p2 = scmp.lt.s32.totalorder %s1021_s14, %s1017_s13 }
  0x1a   :  { %167 = vperm.xlu1 %1016, %v138_v21   ;;  %55 = vperm.xlu0 %1015, %v26_v22   ;;  %p1024_p3 = por %p1023_p2, %p1022_p1 }
  0x1c   :  { %p1025_p4 = pnand %p1024_p3, %p1018_p0 }
  0x1e   :  { %170 = vperm.xlu1 %1016, %v139_v23   ;;  %58 = vperm.xlu0 %1015, %v27_v24  }
  0x22   :  { %173 = vperm.xlu1 %1016, %v140_v25   ;;  %61 = vperm.xlu0 %1015, %v28_v26  }
  0x26   :  { %176 = vperm.xlu1 %1016, %v141_v27   ;;  %64 = vperm.xlu0 %1015, %v29_v28  }
  0x2a   :  { %179 = vperm.xlu1 %1016, %v142_v29   ;;  %67 = vperm.xlu0 %1015, %v30_v30  }
  0x2e   :  { %182 = vperm.xlu1 %1016, %v143_v31   ;;  %70 = vperm.xlu0 %1015, %v31_v32  }
  0x32   :  { %185 = vperm.xlu1 %1016, %v144_v33   ;;  %73 = vperm.xlu0 %1015, %v32_v34  }
  0x36   :  { %188 = vperm.xlu1 %1016, %v145_v35   ;;  %76 = vperm.xlu0 %1015, %v33_v36  }
  0x3a   :  { %191 = vperm.xlu1 %1016, %v146_v37   ;;  %79 = vperm.xlu0 %1015, %v34_v38  }
  0x3e   :  { %194 = vperm.xlu1 %1016, %v147_v39   ;;  %82 = vperm.xlu0 %1015, %v35_v40  }
  0x7d   :  { %v41_v43 = vpop.permute.xlu1 %40  ;;  %v38_v44 = vpop.permute.xlu0 %37 }
  0x7e   :  { %vm85_vm1 = vcmp.eq.s32.totalorder %v41_v43, %v1188_v42  ;;  %vm84_vm2 = vcmp.eq.s32.totalorder %v38_v44, %v1188_v42 }
  0x7f   :  { %v845_v46 = vsel %vm85_vm1, 1.0, %v1040_v45  ;;  %v844_v47 = vsel %vm84_vm2, 1.0, %v1040_v45 }
  0x80   :  { %956 = vmatprep.mubr.msk.f32.mxu0 %vm248_vm0, %v844_v47 }
  0x81   :  { %v153_v48 = vpop.permute.xlu1 %152  ;;  %v150_v49 = vpop.permute.xlu0 %149  ;;  %957 = vmatmul.mubr.msk.f32.vlgmr.msra.gmra.mxu0 %vm248_vm0, %v845_v46 }
  0x82   :  { %vm197_vm3 = vcmp.eq.s32.totalorder %v153_v48, %v1188_v42  ;;  %vm196_vm4 = vcmp.eq.s32.totalorder %v150_v49, %v1188_v42 }
  0x83   :  { %v861_v50 = vsel %vm197_vm3, 1.0, %v1040_v45  ;;  %v860_v51 = vsel %vm196_vm4, 1.0, %v1040_v45 }
  0x84   :  { %988 = vmatprep.mubr.msk.f32.mxu1 %vm248_vm0, %v860_v51 }
  0x85   :  { %v156_v52 = vpop.permute.xlu1 %155  ;;  %v44_v53 = vpop.permute.xlu0 %43  ;;  %989 = vmatmul.mubr.msk.f32.vlgmr.msra.gmra.mxu1 %vm248_vm0, %v861_v50 }
  0x86   :  { %vm198_vm5 = vcmp.eq.s32.totalorder %v156_v52, %v1188_v42  ;;  %vm86_vm6 = vcmp.eq.s32.totalorder %v44_v53, %v1188_v42 }
  0x87   :  { %v862_v54 = vsel %vm198_vm5, 1.0, %v1040_v45  ;;  %v846_v55 = vsel %vm86_vm6, 1.0, %v1040_v45 }
  0x88   :  { %959 = vmatprep.mubr.msk.f32.mxu0 %vm248_vm0, %v846_v55  ;;  %991 = vmatprep.mubr.msk.f32.mxu1 %vm248_vm0, %v862_v54 }
  0x89   :  { %v159_v56 = vpop.permute.xlu1 %158  ;;  %v47_v57 = vpop.permute.xlu0 %46 }
  0x8a   :  { %vm199_vm7 = vcmp.eq.s32.totalorder %v159_v56, %v1188_v42  ;;  %vm87_vm8 = vcmp.eq.s32.totalorder %v47_v57, %v1188_v42 }
  0x8b   :  { %v863_v58 = vsel %vm199_vm7, 1.0, %v1040_v45  ;;  %v847_v59 = vsel %vm87_vm8, 1.0, %v1040_v45 }
  0x8c   :  { %960 = vmatmul.mubr.msk.f32.gmra.mxu0 %vm248_vm0, %v847_v59  ;;  %992 = vmatmul.mubr.msk.f32.gmra.mxu1 %vm248_vm0, %v863_v58 }
  0x8d   :  { %v162_v60 = vpop.permute.xlu1 %161  ;;  %v50_v61 = vpop.permute.xlu0 %49 }
  0x8e   :  { %vm200_vm9 = vcmp.eq.s32.totalorder %v162_v60, %v1188_v42  ;;  %vm88_vm10 = vcmp.eq.s32.totalorder %v50_v61, %v1188_v42 }
  0x8f   :  { %v864_v62 = vsel %vm200_vm9, 1.0, %v1040_v45  ;;  %v848_v63 = vsel %vm88_vm10, 1.0, %v1040_v45 }
  0x90   :  { %962 = vmatprep.mubr.msk.f32.mxu0 %vm248_vm0, %v848_v63  ;;  %994 = vmatprep.mubr.msk.f32.mxu1 %vm248_vm0, %v864_v62 }
  0x91   :  { %v165_v0 = vpop.permute.xlu1 %164  ;;  %v53_v1 = vpop.permute.xlu0 %52 }
  0x92   :  { %vm201_vm11 = vcmp.eq.s32.totalorder %v165_v0, %v1188_v42  ;;  %vm89_vm12 = vcmp.eq.s32.totalorder %v53_v1, %v1188_v42 }
  0x93   :  { %v865_v2 = vsel %vm201_vm11, 1.0, %v1040_v45  ;;  %v849_v3 = vsel %vm89_vm12, 1.0, %v1040_v45 }
  0x94   :  { %963 = vmatmul.mubr.msk.f32.gmra.mxu0 %vm248_vm0, %v849_v3  ;;  %995 = vmatmul.mubr.msk.f32.gmra.mxu1 %vm248_vm0, %v865_v2 }
  0x95   :  { %v168_v4 = vpop.permute.xlu1 %167  ;;  %v56_v5 = vpop.permute.xlu0 %55 }
  0x96   :  { %vm202_vm13 = vcmp.eq.s32.totalorder %v168_v4, %v1188_v42  ;;  %vm90_vm14 = vcmp.eq.s32.totalorder %v56_v5, %v1188_v42 }
  0x97   :  { %v866_v6 = vsel %vm202_vm13, 1.0, %v1040_v45  ;;  %v850_v7 = vsel %vm90_vm14, 1.0, %v1040_v45 }
  0x98   :  { %965 = vmatprep.mubr.msk.f32.mxu0 %vm248_vm0, %v850_v7  ;;  %997 = vmatprep.mubr.msk.f32.mxu1 %vm248_vm0, %v866_v6 }
  0x99   :  { %v171_v8 = vpop.permute.xlu1 %170  ;;  %v59_v9 = vpop.permute.xlu0 %58 }
  0x9a   :  { %vm203_vm15 = vcmp.eq.s32.totalorder %v171_v8, %v1188_v42  ;;  %vm91_vm1 = vcmp.eq.s32.totalorder %v59_v9, %v1188_v42 }
  0x9b   :  { %v867_v10 = vsel %vm203_vm15, 1.0, %v1040_v45  ;;  %v851_v11 = vsel %vm91_vm1, 1.0, %v1040_v45 }
  0x9c   :  { %966 = vmatmul.mubr.msk.f32.gmra.mxu0 %vm248_vm0, %v851_v11  ;;  %998 = vmatmul.mubr.msk.f32.gmra.mxu1 %vm248_vm0, %v867_v10 }
  0x9d   :  { %v174_v12 = vpop.permute.xlu1 %173  ;;  %v62_v13 = vpop.permute.xlu0 %61 }
  0x9e   :  { %vm204_vm2 = vcmp.eq.s32.totalorder %v174_v12, %v1188_v42  ;;  %vm92_vm3 = vcmp.eq.s32.totalorder %v62_v13, %v1188_v42 }
  0x9f   :  { %v868_v14 = vsel %vm204_vm2, 1.0, %v1040_v45  ;;  %v852_v15 = vsel %vm92_vm3, 1.0, %v1040_v45  ;;  %vm735_vm3 = vcmask 195712  }
  0xa0   :  { %968 = vmatprep.mubr.msk.f32.mxu0 %vm248_vm0, %v852_v15  ;;  %1000 = vmatprep.mubr.msk.f32.mxu1 %vm248_vm0, %v868_v14 }
  0xa1   :  { %v177_v16 = vpop.permute.xlu1 %176  ;;  %v65_v17 = vpop.permute.xlu0 %64 }
  0xa2   :  { %vm205_vm4 = vcmp.eq.s32.totalorder %v177_v16, %v1188_v42  ;;  %vm93_vm5 = vcmp.eq.s32.totalorder %v65_v17, %v1188_v42 }
  0xa3   :  { %v869_v18 = vsel %vm205_vm4, 1.0, %v1040_v45  ;;  %v853_v19 = vsel %vm93_vm5, 1.0, %v1040_v45  ;;  %vm742_vm4 = vcmask 261312   ;;  %vm749_vm5 = vcmask 326912  }
  0xa4   :  { %969 = vmatmul.mubr.msk.f32.gmra.mxu0 %vm248_vm0, %v853_v19  ;;  %1001 = vmatmul.mubr.msk.f32.gmra.mxu1 %vm248_vm0, %v869_v18 }
  0xa5   :  { %v180_v20 = vpop.permute.xlu1 %179  ;;  %v68_v21 = vpop.permute.xlu0 %67 }
  0xa6   :  { %vm206_vm6 = vcmp.eq.s32.totalorder %v180_v20, %v1188_v42  ;;  %vm94_vm7 = vcmp.eq.s32.totalorder %v68_v21, %v1188_v42 }
  0xa7   :  { %v870_v22 = vsel %vm206_vm6, 1.0, %v1040_v45  ;;  %v854_v23 = vsel %vm94_vm7, 1.0, %v1040_v45  ;;  %vm756_vm6 = vcmask 392512   ;;  %vm763_vm7 = vcmask 458112  }
  0xa8   :  { %971 = vmatprep.mubr.msk.f32.mxu0 %vm248_vm0, %v854_v23  ;;  %1003 = vmatprep.mubr.msk.f32.mxu1 %vm248_vm0, %v870_v22 }
  0xa9   :  { %v183_v24 = vpop.permute.xlu1 %182  ;;  %v71_v25 = vpop.permute.xlu0 %70 }
  0xaa   :  { %vm207_vm8 = vcmp.eq.s32.totalorder %v183_v24, %v1188_v42  ;;  %vm95_vm9 = vcmp.eq.s32.totalorder %v71_v25, %v1188_v42 }
  0xab   :  { %v871_v26 = vsel %vm207_vm8, 1.0, %v1040_v45  ;;  %v855_v27 = vsel %vm95_vm9, 1.0, %v1040_v45  ;;  %vm770_vm8 = vcmask 523712   ;;  %vm777_vm9 = vcmask 589312  }
  0xac   :  { %972 = vmatmul.mubr.msk.f32.gmra.mxu0 %vm248_vm0, %v855_v27  ;;  %1004 = vmatmul.mubr.msk.f32.gmra.mxu1 %vm248_vm0, %v871_v26 }
  0xad   :  { %v186_v28 = vpop.permute.xlu1 %185  ;;  %v74_v29 = vpop.permute.xlu0 %73 }
  0xae   :  { %vm208_vm10 = vcmp.eq.s32.totalorder %v186_v28, %v1188_v42  ;;  %vm96_vm11 = vcmp.eq.s32.totalorder %v74_v29, %v1188_v42 }
  0xaf   :  { %v872_v30 = vsel %vm208_vm10, 1.0, %v1040_v45  ;;  %v856_v31 = vsel %vm96_vm11, 1.0, %v1040_v45  ;;  %vm784_vm10 = vcmask 654912   ;;  %vm791_vm11 = vcmask 720512  }
  0xb0   :  { %974 = vmatprep.mubr.msk.f32.mxu0 %vm248_vm0, %v856_v31  ;;  %1006 = vmatprep.mubr.msk.f32.mxu1 %vm248_vm0, %v872_v30 }
  0xb1   :  { %v189_v32 = vpop.permute.xlu1 %188  ;;  %v77_v33 = vpop.permute.xlu0 %76 }
  0xb2   :  { %vm209_vm12 = vcmp.eq.s32.totalorder %v189_v32, %v1188_v42  ;;  %vm97_vm13 = vcmp.eq.s32.totalorder %v77_v33, %v1188_v42 }
  0xb3   :  { %v873_v34 = vsel %vm209_vm12, 1.0, %v1040_v45  ;;  %v857_v35 = vsel %vm97_vm13, 1.0, %v1040_v45  ;;  %vm798_vm12 = vcmask 786112   ;;  %vm805_vm13 = vcmask 851712  }
  0xb4   :  { %975 = vmatmul.mubr.msk.f32.gmra.mxu0 %vm248_vm0, %v857_v35  ;;  %1007 = vmatmul.mubr.msk.f32.gmra.mxu1 %vm248_vm0, %v873_v34 }
  0xb5   :  { %v192_v36 = vpop.permute.xlu1 %191  ;;  %v80_v37 = vpop.permute.xlu0 %79 }
  0xb6   :  { %vm210_vm14 = vcmp.eq.s32.totalorder %v192_v36, %v1188_v42  ;;  %vm98_vm15 = vcmp.eq.s32.totalorder %v80_v37, %v1188_v42 }
  0xb7   :  { %v874_v38 = vsel %vm210_vm14, 1.0, %v1040_v45  ;;  %v858_v39 = vsel %vm98_vm15, 1.0, %v1040_v45  ;;  %vm812_vm14 = vcmask 917312   ;;  %vm819_vm15 = vcmask 982912  }
  0xb8   :  { %977 = vmatprep.mubr.msk.f32.mxu0 %vm248_vm0, %v858_v39  ;;  %1009 = vmatprep.mubr.msk.f32.mxu1 %vm248_vm0, %v874_v38 }
  0xb9   :  { %v195_v40 = vpop.permute.xlu1 %194  ;;  %v83_v43 = vpop.permute.xlu0 %82 }
  0xba   :  { %vm211_vm1 = vcmp.eq.s32.totalorder %v195_v40, %v1188_v42  ;;  %vm99_vm2 = vcmp.eq.s32.totalorder %v83_v43, %v1188_v42 }
  0xbb   :  { %v875_v44 = vsel %vm211_vm1, 1.0, %v1040_v45  ;;  %v859_v46 = vsel %vm99_vm2, 1.0, %v1040_v45  ;;  %vm826_vm1 = vcmask 1048512  }
  0xbc   :  { %978 = vmatmul.mubr.msk.f32.gmra.mxu0 %vm248_vm0, %v859_v46  ;;  %1010 = vmatmul.mubr.msk.f32.gmra.mxu1 %vm248_vm0, %v875_v44 }
 0x141   :  { %v958_v47 = vpop.f32.mrf.mxu0 }
 0x143   :  { %v363_v50 = vpop.f32.mrf.mxu0 }
 0x145   :  { %v990_v48 = vpop.f32.mrf.mxu1 }
 0x146   :  { %v640_v49 = vmul.f32 %v990_v48, %v958_v47 }
 0x147   :  { %v560_v51 = vpop.f32.mrf.mxu1 }
 0x148   :  { %v639_v52 = vmul.f32 %v560_v51, %v363_v50  ;;  %v658_v53 = vsel %vm248_vm0, %v640_v49, 0.0  ;;  %v730_v51 = vadd.s32 4294967280, %v1188_v42 }
 0x149   :  { %659 = vadd.xlane.f32.xlu1 %v658_v53  ;;  %v723_v53 = vadd.s32 4294967288, %v1188_v42 }
 0x14a   :  { %v655_v54 = vsel %vm248_vm0, %v639_v52, 0.0  ;;  %v1304_v52 = vshrl.u32 %v18_v41, 7 }
 0x14b   :  { %656 = vadd.xlane.f32.xlu0 %v655_v54 }
 0x14c   :  { %v961_v55 = vpop.f32.mrf.mxu0  ;;  %v993_v56 = vpop.f32.mrf.mxu1  ;;  %v721_v54 = vsub.s32 %v1188_v42, %v1304_v52 }
 0x14d   :  { %v642_v57 = vmul.f32 %v993_v56, %v961_v55  ;;  %v733_v55 = vsub.s32 %v730_v51, %v1304_v52  ;;  %v744_v56 = vadd.s32 4294967264, %v1188_v42 }
 0x14e   :  { %v373_v45 = vpop.f32.mrf.mxu0  ;;  %v570_v58 = vpop.f32.mrf.mxu1 }
 0x14f   :  { %v641_v59 = vmul.f32 %v570_v58, %v373_v45  ;;  %v664_v60 = vsel %vm248_vm0, %v642_v57, 0.0  ;;  %v726_v57 = vsub.s32 %v723_v53, %v1304_v52  ;;  %v737_v58 = vadd.s32 4294967272, %v1188_v42 }
 0x150   :  { %665 = vadd.xlane.f32.xlu0 %v664_v60  ;;  %v747_v41 = vsub.s32 %v744_v56, %v1304_v52 }
 0x151   :  { %v661_v61 = vsel %vm248_vm0, %v641_v59, 0.0 }
 0x154   :  { %v996_v62 = vpop.f32.mrf.mxu1  ;;  %662 = vadd.xlane.f32.xlu0 %v661_v61  ;;  %v964_v63 = vpop.f32.mrf.mxu0 }
 0x155   :  { %v644_v0 = vmul.f32 %v996_v62, %v964_v63  ;;  %v758_v62 = vadd.s32 4294967248, %v1188_v42 }
 0x156   :  { %v383_v1 = vpop.f32.mrf.mxu0  ;;  %v580_v2 = vpop.f32.mrf.mxu1 }
 0x157   :  { %v643_v3 = vmul.f32 %v580_v2, %v383_v1  ;;  %v670_v4 = vsel %vm248_vm0, %v644_v0, 0.0  ;;  %v740_v0 = vsub.s32 %v737_v58, %v1304_v52  ;;  %v751_v1 = vadd.s32 4294967256, %v1188_v42 }
 0x158   :  { %671 = vadd.xlane.f32.xlu0 %v670_v4 }
 0x159   :  { %v667_v5 = vsel %vm248_vm0, %v643_v3, 0.0 }
 0x15a   :  { %668 = vadd.xlane.f32.xlu1 %v667_v5 }
 0x15c   :  { %v967_v6 = vpop.f32.mrf.mxu0  ;;  %v999_v7 = vpop.f32.mrf.mxu1 }
 0x15d   :  { %v646_v8 = vmul.f32 %v999_v7, %v967_v6  ;;  %v761_v7 = vsub.s32 %v758_v62, %v1304_v52 }
 0x15e   :  { %v393_v9 = vpop.f32.mrf.mxu0  ;;  %v590_v10 = vpop.f32.mrf.mxu1 }
 0x15f   :  { %v645_v11 = vmul.f32 %v590_v10, %v393_v9  ;;  %v676_v12 = vsel %vm248_vm0, %v646_v8, 0.0  ;;  %v772_v8 = vadd.s32 4294967232, %v1188_v42  ;;  %v754_v10 = vsub.s32 %v751_v1, %v1304_v52 }
 0x160   :  { %677 = vadd.xlane.f32.xlu0 %v676_v12 }
 0x161   :  { %v673_v13 = vsel %vm248_vm0, %v645_v11, 0.0  ;;  %v765_v11 = vadd.s32 4294967240, %v1188_v42 }
 0x162   :  { %674 = vadd.xlane.f32.xlu1 %v673_v13 }
 0x164   :  { %v970_v14 = vpop.f32.mrf.mxu0  ;;  %v1002_v15 = vpop.f32.mrf.mxu1 }
 0x165   :  { %v648_v16 = vmul.f32 %v1002_v15, %v970_v14 }
 0x166   :  { %v403_v17 = vpop.f32.mrf.mxu0  ;;  %v600_v18 = vpop.f32.mrf.mxu1 }
 0x167   :  { %v647_v19 = vmul.f32 %v600_v18, %v403_v17  ;;  %v682_v20 = vsel %vm248_vm0, %v648_v16, 0.0  ;;  %v775_v17 = vsub.s32 %v772_v8, %v1304_v52  ;;  %v786_v18 = vadd.s32 4294967216, %v1188_v42 }
 0x168   :  { %683 = vadd.xlane.f32.xlu0 %v682_v20  ;;  %v768_v20 = vsub.s32 %v765_v11, %v1304_v52 }
 0x169   :  { %v679_v21 = vsel %vm248_vm0, %v647_v19, 0.0 }
 0x16a   :  { %680 = vadd.xlane.f32.xlu1 %v679_v21  ;;  %v779_v21 = vadd.s32 4294967224, %v1188_v42 }
 0x16c   :  { %v973_v22 = vpop.f32.mrf.mxu0  ;;  %v1005_v23 = vpop.f32.mrf.mxu1 }
 0x16d   :  { %v650_v24 = vmul.f32 %v1005_v23, %v973_v22 }
 0x16e   :  { %v413_v25 = vpop.f32.mrf.mxu0  ;;  %v610_v26 = vpop.f32.mrf.mxu1 }
 0x16f   :  { %v649_v27 = vmul.f32 %v610_v26, %v413_v25  ;;  %v688_v28 = vsel %vm248_vm0, %v650_v24, 0.0 }
 0x170   :  { %689 = vadd.xlane.f32.xlu0 %v688_v28  ;;  %v800_v28 = vadd.s32 4294967200, %v1188_v42 }
 0x171   :  { %v685_v29 = vsel %vm248_vm0, %v649_v27, 0.0  ;;  %v789_v27 = vsub.s32 %v786_v18, %v1304_v52 }
 0x172   :  { %686 = vadd.xlane.f32.xlu1 %v685_v29 }
 0x174   :  { %v976_v30 = vpop.f32.mrf.mxu0  ;;  %v1008_v31 = vpop.f32.mrf.mxu1 }
 0x175   :  { %v652_v32 = vmul.f32 %v1008_v31, %v976_v30  ;;  %v782_v30 = vsub.s32 %v779_v21, %v1304_v52  ;;  %v793_v31 = vadd.s32 4294967208, %v1188_v42 }
 0x176   :  { %v423_v33 = vpop.f32.mrf.mxu0  ;;  %v620_v34 = vpop.f32.mrf.mxu1 }
 0x177   :  { %v651_v35 = vmul.f32 %v620_v34, %v423_v33  ;;  %v694_v36 = vsel %vm248_vm0, %v652_v32, 0.0 }
 0x178   :  { %695 = vadd.xlane.f32.xlu0 %v694_v36 }
 0x179   :  { %v691_v37 = vsel %vm248_vm0, %v651_v35, 0.0 }
 0x17a   :  { %692 = vadd.xlane.f32.xlu1 %v691_v37  ;;  %v803_v37 = vsub.s32 %v800_v28, %v1304_v52 }
 0x17c   :  { %v979_v38 = vpop.f32.mrf.mxu0  ;;  %v1011_v39 = vpop.f32.mrf.mxu1 }
 0x17d   :  { %v654_v40 = vmul.f32 %v1011_v39, %v979_v38  ;;  %v796_v39 = vsub.s32 %v793_v31, %v1304_v52 }
 0x17e   :  { %v433_v43 = vpop.f32.mrf.mxu0  ;;  %v630_v44 = vpop.f32.mrf.mxu1 }
 0x17f   :  { %v653_v46 = vmul.f32 %v630_v44, %v433_v43  ;;  %v700_v47 = vsel %vm248_vm0, %v654_v40, 0.0  ;;  %v807_v40 = vadd.s32 4294967192, %v1188_v42  ;;  %v814_v44 = vadd.s32 4294967184, %v1188_v42 }
 0x180   :  { %701 = vadd.xlane.f32.xlu0 %v700_v47  ;;  %v821_v47 = vadd.s32 4294967176, %v1188_v42 }
 0x181   :  { %v697_v48 = vsel %vm248_vm0, %v653_v46, 0.0  ;;  %vm728_vm0 = vcmask 130112   ;;  %v810_v53 = vsub.s32 %v807_v40, %v1304_v52 }
 0x182   :  { %698 = vadd.xlane.f32.xlu1 %v697_v48  ;;  %v824_v56 = vsub.s32 %v821_v47, %v1304_v52 }
 0x1d2   :  { %v660_v45 = vpop.xlane.xlu1 %659 }
 0x1d3   :  { %v727_v63 = vrot.slane %v660_v45, %v726_v57 }
 0x1d4   :  { %v657_v49 = vpop.xlane.xlu0 %656 }
 0x1d5   :  { %v722_v60 = vrot.slane %v657_v49, %v721_v54  ;;  %v817_v54 = vsub.s32 %v814_v44, %v1304_v52 }
 0x1d7   :  { %v729_v3 = vsel %vm728_vm0, %v727_v63, %v722_v60 }
 0x1d9   :  { %v666_v50 = vpop.xlane.xlu0 %665 }
 0x1da   :  { %v741_v9 = vrot.slane %v666_v50, %v740_v0 }
 0x1dd   :  { %v663_v59 = vpop.xlane.xlu0 %662 }
 0x1de   :  { %v734_v61 = vrot.slane %v663_v59, %v733_v55 }
 0x1e0   :  { %v736_v4 = vsel %vm735_vm3, %v734_v61, %v729_v3 }
 0x1e1   :  { %v672_v5 = vpop.xlane.xlu0 %671  ;;  %v743_v13 = vsel %vm742_vm4, %v741_v9, %v736_v4 }
 0x1e2   :  { %v755_v19 = vrot.slane %v672_v5, %v754_v10 }
 0x1e3   :  { %v669_v2 = vpop.xlane.xlu1 %668 }
 0x1e4   :  { %v748_v6 = vrot.slane %v669_v2, %v747_v41 }
 0x1e6   :  { %v750_v14 = vsel %vm749_vm5, %v748_v6, %v743_v13 }
 0x1e7   :  { %v757_v23 = vsel %vm756_vm6, %v755_v19, %v750_v14 }
 0x1e9   :  { %v678_v15 = vpop.xlane.xlu0 %677 }
 0x1ea   :  { %v769_v29 = vrot.slane %v678_v15, %v768_v20 }
 0x1eb   :  { %v675_v12 = vpop.xlane.xlu1 %674 }
 0x1ec   :  { %v762_v16 = vrot.slane %v675_v12, %v761_v7 }
 0x1ee   :  { %v764_v24 = vsel %vm763_vm7, %v762_v16, %v757_v23 }
 0x1ef   :  { %v771_v33 = vsel %vm770_vm8, %v769_v29, %v764_v24 }
 0x1f1   :  { %v684_v25 = vpop.xlane.xlu0 %683 }
 0x1f2   :  { %v783_v38 = vrot.slane %v684_v25, %v782_v30 }
 0x1f3   :  { %v681_v22 = vpop.xlane.xlu1 %680 }
 0x1f4   :  { %v776_v26 = vrot.slane %v681_v22, %v775_v17 }
 0x1f6   :  { %v778_v34 = vsel %vm777_vm9, %v776_v26, %v771_v33 }
 0x1f7   :  { %v785_v46 = vsel %vm784_vm10, %v783_v38, %v778_v34 }
 0x1f9   :  { %v690_v35 = vpop.xlane.xlu0 %689 }
 0x1fa   :  { %v797_v51 = vrot.slane %v690_v35, %v796_v39 }
 0x1fb   :  { %v687_v32 = vpop.xlane.xlu1 %686 }
 0x1fc   :  { %v790_v36 = vrot.slane %v687_v32, %v789_v27 }
 0x1fe   :  { %v792_v48 = vsel %vm791_vm11, %v790_v36, %v785_v46 }
 0x1ff   :  { %v799_v55 = vsel %vm798_vm12, %v797_v51, %v792_v48 }
 0x201   :  { %v696_v49 = vpop.xlane.xlu0 %695 }
 0x202   :  { %v811_v58 = vrot.slane %v696_v49, %v810_v53 }
 0x203   :  { %v693_v43 = vpop.xlane.xlu1 %692 }
 0x204   :  { %v804_v50 = vrot.slane %v693_v43, %v803_v37 }
 0x206   :  { %v806_v57 = vsel %vm805_vm13, %v804_v50, %v799_v55 }
 0x207   :  { %v813_v61 = vsel %vm812_vm14, %v811_v58, %v806_v57 }
 0x209   :  { %v702_v45 = vpop.xlane.xlu0 %701 }
 0x20a   :  { %v825_v60 = vrot.slane %v702_v45, %v824_v56 }
 0x20b   :  { %v699_v59 = vpop.xlane.xlu1 %698 }
 0x20c   :  { %v818_v42 = vrot.slane %v699_v59, %v817_v54 }
 0x20e   :  { %v820_v41 = vsel %vm819_vm15, %v818_v42, %v813_v61 }
 0x20f   :  { %v827_v62 = vsel %vm826_vm1, %v825_v60, %v820_v41 }
 0x210   :  { %829 = vst [vmem:[#allocation2] sm:$0x1] %v827_v62 }
 0x211   :  { %1028 = shalt.err (!%p1025_p4)
}
 0x212   :  { %839 = dma.vmem_to_hbm [thread:$0]  %s837_s1, 16, %s1344_s4, [#allocation3]  }
 0x213   :  { %1037 = dma.done.wait [#allocation3], 16  }
 0x214   :  { %1038 = vsyncadd [#allocation3], 4294967280 }
 0x215   :  { %843 = vsyncpa [#allocation3], 1 }

</bundles_post_ra>
